<compile_context>
chip_gen: v5e
topology: v5e:2x2
jax: 0.10.0
libtpu: 0.0.40
codegen_flags: <defaults>
</compile_context>

<pallas_src>
import functools

import jax
import jax.numpy as jnp
from jax import lax
from jax.experimental import pallas as pl
from jax.experimental.pallas import tpu as pltpu

_H1 = 80
_H2 = 10


def _round_up(n, m):
    return ((n + m - 1) // m) * m


def _vmem_bytes_per_batch_elem(dim, compute_itemsize):
    """Conservative VMEM bytes per batch element inside the kernel."""
    lane_dim = max(_round_up(dim, 128), 128)     # x tile is lane-padded when dim < 128
    bytes_per = 0
    bytes_per += 2 * lane_dim * 4                # double-buffered (block_b, dim) x tile (f32)
    bytes_per += lane_dim * compute_itemsize     # in-kernel cast copy of the x tile
    bytes_per += _H1 * 4                         # h1 (80, block_b) f32
    bytes_per += _H1 * compute_itemsize          # h1 in compute dtype for fc_2
    bytes_per += _round_up(_H2, 8) * 4           # h2 (10 -> 16 sublanes, block_b) f32
    bytes_per += 2 * 8 * 4                       # double-buffered (1, block_b) output row
    return bytes_per


def _choose_block_b(B, dim, compute_itemsize, vmem_budget_bytes):
    """Largest lane-aligned batch tile that fits the VMEM budget, while still
    leaving a few grid steps for pipelining / dual-TensorCore sharding."""
    per_elem = _vmem_bytes_per_batch_elem(dim, compute_itemsize)
    cap = max(128, (vmem_budget_bytes // per_elem) // 128 * 128)
    # Keep ~4 grid steps when the batch allows it so BlockSpec double-buffering
    # overlaps the x DMA with compute and ("parallel",) can use both v7x cores.
    # For huge batches the VMEM cap dominates (big tiles amortize the ~0.35 us
    # fixed per-step cost towards HBM roofline).
    want = max(128, _round_up(pl.cdiv(B, 4), 128))
    return int(min(cap, want))


def _mlp_kernel(x_ref, w1_ref, b1_ref, w2_ref, b2_ref, w3_ref, b3_ref, o_ref,
                *, compute_dtype):
    # x tile arrives as (block_b, dim) in its original (f32) dtype; cast (if
    # any) happens here, in VMEM, so there is no extra HBM pass in the wrapper.
    xc = x_ref[...].astype(compute_dtype)                          # (block_b, dim)

    # fc_1 (dim -> 80): transposed-operand matmul on the MXU - contract both
    # operands on the feature axis so no (dim, block_b) transpose copy is
    # materialized.  Batch stays on lanes; accumulation is f32.
    h1 = lax.dot_general(
        w1_ref[...].astype(compute_dtype), xc,
        dimension_numbers=(((1,), (1,)), ((), ())),
        preferred_element_type=jnp.float32)                        # (80, block_b)
    h1 = jnp.maximum(h1 + b1_ref[...], 0.0)
    # dropout: identity in eval/inference mode.

    # fc_2 (80 -> 10): small MXU matmul in the compute dtype, f32 accumulate.
    h2 = jnp.dot(w2_ref[...].astype(compute_dtype), h1.astype(compute_dtype),
                 preferred_element_type=jnp.float32)               # (10, block_b)
    h2 = jnp.maximum(h2 + b2_ref[...], 0.0)
    # dropout: identity in eval/inference mode.

    # fc_3 (10 -> 1): VPU multiply + sublane reduce (an MXU matmul with N=1
    # would be ~99% padding).  Result is a lane-dense row.
    out = jnp.sum(h2 * w3_ref[...], axis=0, keepdims=True) + b3_ref[...]  # (1, block_b)
    o_ref[...] = out.astype(o_ref.dtype)


def mlp_forward(x, params, *, block_b=None, compute_dtype=jnp.float32,
                vmem_budget_bytes=20 * 1024 * 1024):
    """x: [B, dim].  Returns [B] float32 (torch's .squeeze(dim=1)).

    params are in torch layout: W[out, in], b[out].
    compute_dtype=jnp.bfloat16 runs fc_1/fc_2 on the MXU at native bf16 rate
    (casts happen inside the kernel, accumulation stays f32).
    vmem_budget_bytes caps the kernel working set; the 20 MiB default is safe
    on v7x, raise it (e.g. 48-64 MiB) on v6e/v5e for bigger tiles.
    """
    w1, b1, w2, b2, w3, b3 = params
    B, dim = x.shape
    compute_dtype = jnp.dtype(compute_dtype)

    if block_b is None:
        block_b = _choose_block_b(B, dim, compute_dtype.itemsize, vmem_budget_bytes)
    assert block_b % 128 == 0, "block_b must be a multiple of 128 (lane-dense output)"

    # Ragged last x tile instead of a wrapper-side jnp.pad (which would add a
    # full read+write HBM pass over x).  Out-of-bounds rows of the edge block
    # only produce outputs beyond column B, which are sliced off below.
    grid = pl.cdiv(B, block_b)
    b_out = grid * block_b  # padded output width -> unmasked lane-dense stores

    # Tiny parameter arrays: reshape biases to columns, w3 to a (10, 1) column.
    h1d, h2d = w1.shape[0], w2.shape[0]
    b1k = b1.astype(jnp.float32).reshape(h1d, 1)          # (80, 1)
    b2k = b2.astype(jnp.float32).reshape(h2d, 1)          # (10, 1)
    w3k = w3.astype(jnp.float32).reshape(1, h2d).T        # (10, 1)
    b3k = b3.astype(jnp.float32).reshape(1, 1)            # (1, 1)

    kernel = functools.partial(_mlp_kernel, compute_dtype=compute_dtype)
    vmem_limit = int(max(32 * 1024 * 1024, vmem_budget_bytes + 12 * 1024 * 1024))

    out = pl.pallas_call(
        kernel,
        out_shape=jax.ShapeDtypeStruct((1, b_out), jnp.float32),
        grid_spec=pltpu.PrefetchScalarGridSpec(
            num_scalar_prefetch=0,
            grid=(grid,),
            in_specs=[
                pl.BlockSpec((block_b, dim), lambda i: (i, 0)),   # x tile (pipelined)
                # Constant index maps -> fetched once, resident across the grid.
                pl.BlockSpec(w1.shape, lambda i: (0, 0)),
                pl.BlockSpec(b1k.shape, lambda i: (0, 0)),
                pl.BlockSpec(w2.shape, lambda i: (0, 0)),
                pl.BlockSpec(b2k.shape, lambda i: (0, 0)),
                pl.BlockSpec(w3k.shape, lambda i: (0, 0)),
                pl.BlockSpec(b3k.shape, lambda i: (0, 0)),
            ],
            # Lane-dense output: each grid step writes a full 128*k-wide slab.
            out_specs=pl.BlockSpec((1, block_b), lambda i: (0, i)),
        ),
        compiler_params=pltpu.CompilerParams(
            dimension_semantics=("parallel",),   # megacore / v7x dual-TC sharding
            vmem_limit_bytes=vmem_limit,
        ),
    )(x, w1.astype(jnp.float32), b1k, w2.astype(jnp.float32), b2k, w3k, b3k)

    return out[0, :B]  # drop padded columns, squeeze(dim=1)


def init_params(key, dim):
    """Deterministic init with torch parameter shapes: W[out, in], b[out]."""
    ks = jax.random.split(key, 6)

    def linear(kw, kb, fan_in, fan_out):
        bound = 1.0 / jnp.sqrt(float(fan_in))
        w = jax.random.uniform(kw, (fan_out, fan_in), jnp.float32, -bound, bound)
        b = jax.random.uniform(kb, (fan_out,), jnp.float32, -bound, bound)
        return w, b

    w1, b1 = linear(ks[0], ks[1], dim, _H1)
    w2, b2 = linear(ks[2], ks[3], _H1, _H2)
    w3, b3 = linear(ks[4], ks[5], _H2, 1)
    return (w1, b1, w2, b2, w3, b3)


def mlp_reference(x, params):
    w1, b1, w2, b2, w3, b3 = params
    h = jnp.maximum(x @ w1.T + b1, 0.0)
    h = jnp.maximum(h @ w2.T + b2, 0.0)
    return (h @ w3.T + b3)[:, 0]


if __name__ == "__main__":
    key = jax.random.PRNGKey(0)
    kx, kp, kx2 = jax.random.split(key, 3)

    DIM = 32
    params = init_params(kp, DIM)

    # Small shape matching the toy spec (B=8): single ragged block.
    x = jax.random.normal(kx, (8, DIM), dtype=jnp.float32)
    out = jax.block_until_ready(mlp_forward(x, params))
    ref = mlp_reference(x, params)
    assert out.shape == (8,), out.shape
    assert jnp.allclose(out, ref, atol=1e-4, rtol=1e-4), (out, ref)

    # Multi-step grid with a ragged last tile (300 = 2*128 + 44): exercises
    # pipelining and the discarded-edge-output invariant.
    x2 = jax.random.normal(kx2, (300, DIM), dtype=jnp.float32)
    out2 = jax.block_until_ready(mlp_forward(x2, params, block_b=128))
    ref2 = mlp_reference(x2, params)
    assert out2.shape == (300,), out2.shape
    assert jnp.allclose(out2, ref2, atol=1e-4, rtol=1e-4), (out2, ref2)

    # Auto-selected (VMEM-budget) block_b.
    out2b = jax.block_until_ready(mlp_forward(x2, params))
    assert out2b.shape == (300,), out2b.shape
    assert jnp.allclose(out2b, ref2, atol=1e-4, rtol=1e-4), (out2b, ref2)

    # In-kernel bf16 fast path (f32 accumulation) - loose tolerance.
    out3 = jax.block_until_ready(
        mlp_forward(x2, params, block_b=128, compute_dtype=jnp.bfloat16))
    assert out3.shape == (300,), out3.shape
    assert jnp.allclose(out3, ref2, atol=1e-1, rtol=1e-1), (out3, ref2)

    print("KERNEL_OK")
</pallas_src>

<mosaic_0001>
module attributes {stable_mosaic.version = 11 : i64} {
  func.func @_mlp_kernel(%arg0: i32, %arg1: memref<128x32xf32, #tpu.memory_space<vmem>>, %arg2: memref<80x32xf32, #tpu.memory_space<vmem>>, %arg3: memref<80x1xf32, #tpu.memory_space<vmem>>, %arg4: memref<10x80xf32, #tpu.memory_space<vmem>>, %arg5: memref<10x1xf32, #tpu.memory_space<vmem>>, %arg6: memref<10x1xf32, #tpu.memory_space<vmem>>, %arg7: memref<1x1xf32, #tpu.memory_space<vmem>>, %arg8: memref<1x128xf32, #tpu.memory_space<vmem>>) attributes {dimension_semantics = [#tpu.dimension_semantics<parallel>], iteration_bounds = array<i64: 1>, scalar_prefetch = 0 : i64, scratch_operands = 0 : i64, tpu.core_type = #tpu.core_type<tc>, window_params = [{transform_indices = @transform_0, window_bounds = array<i64: 128, 32>}, {pipeline_mode = #tpu.pipeline_mode<synchronous>, transform_indices = @transform_1, window_bounds = array<i64: 80, 32>}, {pipeline_mode = #tpu.pipeline_mode<synchronous>, transform_indices = @transform_2, window_bounds = array<i64: 80, 1>}, {pipeline_mode = #tpu.pipeline_mode<synchronous>, transform_indices = @transform_3, window_bounds = array<i64: 10, 80>}, {pipeline_mode = #tpu.pipeline_mode<synchronous>, transform_indices = @transform_4, window_bounds = array<i64: 10, 1>}, {pipeline_mode = #tpu.pipeline_mode<synchronous>, transform_indices = @transform_5, window_bounds = array<i64: 10, 1>}, {pipeline_mode = #tpu.pipeline_mode<synchronous>, transform_indices = @transform_6, window_bounds = array<i64: 1, 1>}, {transform_indices = @transform_7, window_bounds = array<i64: 1, 128>}]} {
    %c0 = arith.constant 0 : index
    %c0_0 = arith.constant 0 : index
    %0 = vector.load %arg1[%c0, %c0_0] : memref<128x32xf32, #tpu.memory_space<vmem>>, vector<128x32xf32>
    %c0_1 = arith.constant 0 : index
    %c0_2 = arith.constant 0 : index
    %1 = vector.load %arg2[%c0_1, %c0_2] : memref<80x32xf32, #tpu.memory_space<vmem>>, vector<80x32xf32>
    %cst = arith.constant dense<0.000000e+00> : vector<80x128xf32>
    %2 = tpu.matmul %1, %0, %cst {dimension_numbers = #tpu.dot_dimension_numbers<[1], [1], [0], [0], [0, 0, 1, 0], [], []>} : vector<80x32xf32>, vector<128x32xf32>, vector<80x128xf32> -> vector<80x128xf32>
    %c0_3 = arith.constant 0 : index
    %c0_4 = arith.constant 0 : index
    %3 = vector.load %arg3[%c0_3, %c0_4] : memref<80x1xf32, #tpu.memory_space<vmem>>, vector<80x1xf32>
    %4 = vector.broadcast %3 : vector<80x1xf32> to vector<80x128xf32>
    %5 = arith.addf %2, %4 : vector<80x128xf32>
    %cst_5 = arith.constant 0.000000e+00 : f32
    %6 = vector.broadcast %cst_5 : f32 to vector<80x128xf32>
    %7 = arith.maximumf %5, %6 : vector<80x128xf32>
    %c0_6 = arith.constant 0 : index
    %c0_7 = arith.constant 0 : index
    %8 = vector.load %arg4[%c0_6, %c0_7] : memref<10x80xf32, #tpu.memory_space<vmem>>, vector<10x80xf32>
    %cst_8 = arith.constant dense<0.000000e+00> : vector<10x128xf32>
    %9 = tpu.matmul %8, %7, %cst_8 {dimension_numbers = #tpu.dot_dimension_numbers<[1], [0], [0], [1], [0, 0, 1, 1], [], []>} : vector<10x80xf32>, vector<80x128xf32>, vector<10x128xf32> -> vector<10x128xf32>
    %c0_9 = arith.constant 0 : index
    %c0_10 = arith.constant 0 : index
    %10 = vector.load %arg5[%c0_9, %c0_10] : memref<10x1xf32, #tpu.memory_space<vmem>>, vector<10x1xf32>
    %11 = vector.broadcast %10 : vector<10x1xf32> to vector<10x128xf32>
    %12 = arith.addf %9, %11 : vector<10x128xf32>
    %cst_11 = arith.constant 0.000000e+00 : f32
    %13 = vector.broadcast %cst_11 : f32 to vector<10x128xf32>
    %14 = arith.maximumf %12, %13 : vector<10x128xf32>
    %c0_12 = arith.constant 0 : index
    %c0_13 = arith.constant 0 : index
    %15 = vector.load %arg6[%c0_12, %c0_13] : memref<10x1xf32, #tpu.memory_space<vmem>>, vector<10x1xf32>
    %16 = vector.broadcast %15 : vector<10x1xf32> to vector<10x128xf32>
    %17 = arith.mulf %14, %16 : vector<10x128xf32>
    %cst_14 = arith.constant dense<0.000000e+00> : vector<128xf32>
    %18 = vector.multi_reduction <add>, %17, %cst_14 [0] : vector<10x128xf32> to vector<128xf32>
    %19 = vector.shape_cast %18 : vector<128xf32> to vector<1x128xf32>
    %c0_15 = arith.constant 0 : index
    %c0_16 = arith.constant 0 : index
    %20 = vector.load %arg7[%c0_15, %c0_16] : memref<1x1xf32, #tpu.memory_space<vmem>>, vector<1x1xf32>
    %21 = vector.broadcast %20 : vector<1x1xf32> to vector<1x128xf32>
    %22 = arith.addf %19, %21 : vector<1x128xf32>
    %c0_17 = arith.constant 0 : index
    %c0_18 = arith.constant 0 : index
    %23 = vector.load %arg8[%c0_17, %c0_18] : memref<1x128xf32, #tpu.memory_space<vmem>>, vector<1x128xf32>
    tpu.vector_store %arg8[%c0_17, %c0_18], %22 {strides = array<i32>} : memref<1x128xf32, #tpu.memory_space<vmem>>, vector<1x128xf32>,
    return
  }
  func.func @transform_0(%arg0: i32) -> (i32, i32) {
    %c0_i32 = arith.constant 0 : i32
    %c0_i32_0 = arith.constant 0 : i32
    return %arg0, %c0_i32 : i32, i32
  }
  func.func @transform_1(%arg0: i32) -> (i32, i32) {
    %c0_i32 = arith.constant 0 : i32
    %c0_i32_0 = arith.constant 0 : i32
    %c0_i32_1 = arith.constant 0 : i32
    return %c0_i32, %c0_i32_0 : i32, i32
  }
  func.func @transform_2(%arg0: i32) -> (i32, i32) {
    %c0_i32 = arith.constant 0 : i32
    %c0_i32_0 = arith.constant 0 : i32
    %c0_i32_1 = arith.constant 0 : i32
    return %c0_i32, %c0_i32_0 : i32, i32
  }
  func.func @transform_3(%arg0: i32) -> (i32, i32) {
    %c0_i32 = arith.constant 0 : i32
    %c0_i32_0 = arith.constant 0 : i32
    %c0_i32_1 = arith.constant 0 : i32
    return %c0_i32, %c0_i32_0 : i32, i32
  }
  func.func @transform_4(%arg0: i32) -> (i32, i32) {
    %c0_i32 = arith.constant 0 : i32
    %c0_i32_0 = arith.constant 0 : i32
    %c0_i32_1 = arith.constant 0 : i32
    return %c0_i32, %c0_i32_0 : i32, i32
  }
  func.func @transform_5(%arg0: i32) -> (i32, i32) {
    %c0_i32 = arith.constant 0 : i32
    %c0_i32_0 = arith.constant 0 : i32
    %c0_i32_1 = arith.constant 0 : i32
    return %c0_i32, %c0_i32_0 : i32, i32
  }
  func.func @transform_6(%arg0: i32) -> (i32, i32) {
    %c0_i32 = arith.constant 0 : i32
    %c0_i32_0 = arith.constant 0 : i32
    %c0_i32_1 = arith.constant 0 : i32
    return %c0_i32, %c0_i32_0 : i32, i32
  }
  func.func @transform_7(%arg0: i32) -> (i32, i32) {
    %c0_i32 = arith.constant 0 : i32
    %c0_i32_0 = arith.constant 0 : i32
    return %c0_i32, %arg0 : i32, i32
  }
}

</mosaic_0001>

<bundles_post_ra>
// kernel: tpu_custom_call.1
= control target key start
LH: loop header
LB: loop body
LE: loop exit
PB: predicated region body
PF: predicated region fallthrough
CT: control target
= control target key end

     0   :  { %s668_s0 = inlined_call_operand.vmem [shape: f32[8,32], index: 0, kind: input, shape index: {}]   ;;  %s669_s1 = inlined_call_operand.vmem [shape: f32[80,32], index: 1, kind: input, shape index: {}]   ;;  %s670_s2 = inlined_call_operand.vmem [shape: f32[80,1], index: 2, kind: input, shape index: {}]   ;;  %s671_s3 = inlined_call_operand.vmem [shape: f32[10,80], index: 3, kind: input, shape index: {}]   ;;  %s672_s4 = inlined_call_operand.vmem [shape: f32[10,1], index: 4, kind: input, shape index: {}]   ;;  %s673_s5 = inlined_call_operand.vmem [shape: f32[10,1], index: 5, kind: input, shape index: {}]   ;;  %s674_s6 = inlined_call_operand.<no memory space> [shape: f32[1,1], index: 6, kind: input, shape index: {}]   ;;  %s675_s7 = inlined_call_operand.hbm [shape: f32[1,128], index: 7, kind: output, shape index: {}]  }
   0x1   :  { %v12_v0 = vstv %s674_s6 }
   0x2   :  { %13 = vst [vmem:[#allocation2] sm:$0x1] %v12_v0 }
   0x3   :  { %v44_v1 = vld [vmem:[%s668_s0 + $0x78] sm:$0xff]  ;;  %vm115_vm0 = vcmask 261120   ;;  %v43_v2 = vld [vmem:[%s668_s0 + $0x70] sm:$0xff] }
   0x4   :  { %345 = vmatpush.xpose.msk.msra.mxu1 %vm115_vm0, %v44_v1  ;;  %373 = vmatpush.xpose.msk.msra.mxu2 %vm115_vm0, %v44_v1 }
   0x5   :  { %374 = vmatpush.xpose.msk.msra.mxu3 %vm115_vm0, %v44_v1 }
   0x6   :  { %14 = vsyncpa [#allocation4], 0  ;;  %v42_v3 = vld [vmem:[%s668_s0 + $0x68] sm:$0xff]  ;;  %v41_v4 = vld [vmem:[%s668_s0 + $0x60] sm:$0xff]  ;;  %v436_v10 = vmov 0   ;;  %vm265_vm1 = vcmask 654336  }
   0x7   :  { %v40_v5 = vld [vmem:[%s668_s0 + $0x58] sm:$0xff]  ;;  %v39_v6 = vld [vmem:[%s668_s0 + $0x50] sm:$0xff]  ;;  %v38_v7 = vld [vmem:[%s668_s0 + $0x48] sm:$0xff]  ;;  %407 = vset.pattern.permute.xlu0 %v436_v10  ;;  %408 = vset.pattern.permute.xlu1 %v436_v10  ;;  %vm311_vm2 = vcmask 1041408  }
   0x8   :  { %346 = vmatpush.xpose.msk.msra.mxu1 %vm115_vm0, %v43_v2  ;;  %375 = vmatpush.xpose.msk.msra.mxu2 %vm115_vm0, %v43_v2  ;;  %v37_v8 = vld [vmem:[%s668_s0 + $0x40] sm:$0xff]  ;;  %v64_v9 = vld [vmem:[%s670_s2 + $0x48] sm:$0xff]  ;;  %v36_v11 = vld [vmem:[%s668_s0 + $0x38] sm:$0xff] }
   0x9   :  { %376 = vmatpush.xpose.msk.msra.mxu3 %vm115_vm0, %v43_v2  ;;  %112 = vperm.xlu0 %407, %v64_v9   ;;  %v62_v12 = vld [vmem:[%s670_s2 + $0x38] sm:$0xff]  ;;  %v63_v13 = vld [vmem:[%s670_s2 + $0x40] sm:$0xff]  ;;  %v35_v14 = vld [vmem:[%s668_s0 + $0x30] sm:$0xff] }
   0xa   :  { %409 = vset.pattern.permute.xlu2 %v436_v10  ;;  %102 = vperm.xlu1 %408, %v62_v12   ;;  %v61_v15 = vld [vmem:[%s670_s2 + $0x30] sm:$0xff]  ;;  %v34_v16 = vld [vmem:[%s668_s0 + $0x28] sm:$0xff]  ;;  %v58_v17 = vld [vmem:[%s670_s2 + $0x18] sm:$0xff] }
   0xb   :  { %v33_v18 = vld [vmem:[%s668_s0 + $0x20] sm:$0xff]  ;;  %v57_v19 = vld [vmem:[%s670_s2 + $0x10] sm:$0xff]  ;;  %v32_v20 = vld [vmem:[%s668_s0 + $0x18] sm:$0xff] }
   0xc   :  { %347 = vmatpush.xpose.msk.msra.mxu1 %vm115_vm0, %v42_v3  ;;  %377 = vmatpush.xpose.msk.msra.mxu2 %vm115_vm0, %v42_v3  ;;  %v55_v21 = vld [vmem:[%s670_s2] sm:$0xff]  ;;  %v31_v22 = vld [vmem:[%s668_s0 + $0x10] sm:$0xff]  ;;  %v254_v23 = vld [vmem:[%s672_s4 + $0x8] sm:$0x3] }
   0xd   :  { %378 = vmatpush.xpose.msk.msra.mxu3 %vm115_vm0, %v42_v3  ;;  %v30_v24 = vld [vmem:[%s668_s0 + $0x8] sm:$0xff]  ;;  %v29_v27 = vld [vmem:[%s668_s0] sm:$0xff]  ;;  %v52_v31 = vld [vmem:[%s669_s1 + $0x38] sm:$0xff]  ;;  %s336_s0 = sshll.u32 %s675_s7, 4  ;;  %s337_s0 = int_to_ptr.hbm [resolvable:$true] %s336_s0 }
   0xe   :  { %v60_v25 = vld [vmem:[%s670_s2 + $0x28] sm:$0xff]  ;;  %v297_v28 = vld [vmem:[%s673_s5] sm:$0xff]  ;;  %v47_v37 = vld [vmem:[%s669_s1 + $0x10] sm:$0xff] }
   0xf   :  { %v298_v26 = vld [vmem:[%s673_s5 + $0x8] sm:$0x3]  ;;  %92 = vperm.xlu2 %409, %v60_v25   ;;  %v45_v29 = vld [vmem:[%s669_s1] sm:$0xff]  ;;  %v51_v38 = vld [vmem:[%s669_s1 + $0x30] sm:$0xff] }
  0x10   :  { %348 = vmatpush.xpose.msk.msra.mxu1 %vm115_vm0, %v41_v4  ;;  %379 = vmatpush.xpose.msk.msra.mxu2 %vm115_vm0, %v41_v4  ;;  %v49_v30 = vld [vmem:[%s669_s1 + $0x20] sm:$0xff]  ;;  %v46_v33 = vld [vmem:[%s669_s1 + $0x8] sm:$0xff]  ;;  %v48_v41 = vld [vmem:[%s669_s1 + $0x18] sm:$0xff] }
  0x11   :  { %380 = vmatpush.xpose.msk.msra.mxu3 %vm115_vm0, %v41_v4  ;;  %107 = vperm.xlu0 %407, %v63_v13   ;;  %v59_v32 = vld [vmem:[%s670_s2 + $0x20] sm:$0xff]  ;;  %v50_v34 = vld [vmem:[%s669_s1 + $0x28] sm:$0xff] }
  0x12   :  { %97 = vperm.xlu1 %408, %v61_v15   ;;  %v53_v35 = vld [vmem:[%s669_s1 + $0x40] sm:$0xff]  ;;  %v56_v36 = vld [vmem:[%s670_s2 + $0x8] sm:$0xff] }
  0x13   :  { %v54_v39 = vld [vmem:[%s669_s1 + $0x48] sm:$0xff]  ;;  %v253_v40 = vld [vmem:[%s672_s4] sm:$0xff] }
  0x14   :  { %349 = vmatpush.xpose.msk.msra.mxu1 %vm115_vm0, %v40_v5  ;;  %381 = vmatpush.xpose.msk.msra.mxu2 %vm115_vm0, %v40_v5  ;;  %v320_v42 = vld [vmem:[#allocation2] sm:$0x1] }
  0x15   :  { %382 = vmatpush.xpose.msk.msra.mxu3 %vm115_vm0, %v40_v5 }
  0x17   :  { %87 = vperm.xlu2 %409, %v59_v32  }
  0x18   :  { %350 = vmatpush.xpose.msk.msra.mxu1 %vm115_vm0, %v39_v6  ;;  %383 = vmatpush.xpose.msk.msra.mxu2 %vm115_vm0, %v39_v6 }
  0x19   :  { %384 = vmatpush.xpose.msk.msra.mxu3 %vm115_vm0, %v39_v6  ;;  %82 = vperm.xlu0 %407, %v58_v17  }
  0x1a   :  { %77 = vperm.xlu1 %408, %v57_v19   ;;  %v251_v19 = vld [vmem:[%s671_s3] sm:$0xff] }
  0x1c   :  { %351 = vmatpush.xpose.msk.msra.mxu1 %vm115_vm0, %v38_v7  ;;  %385 = vmatpush.xpose.msk.msra.mxu2 %vm115_vm0, %v38_v7 }
  0x1d   :  { %386 = vmatpush.xpose.msk.msra.mxu3 %vm115_vm0, %v38_v7 }
  0x1f   :  { %72 = vperm.xlu2 %409, %v56_v36  }
  0x20   :  { %352 = vmatpush.xpose.msk.msra.mxu1 %vm115_vm0, %v37_v8  ;;  %387 = vmatpush.xpose.msk.msra.mxu2 %vm115_vm0, %v37_v8 }
  0x21   :  { %388 = vmatpush.xpose.msk.msra.mxu3 %vm115_vm0, %v37_v8  ;;  %67 = vperm.xlu0 %407, %v55_v21  }
  0x22   :  { %262 = vperm.xlu1 %408, %v254_v23  }
  0x24   :  { %353 = vmatpush.xpose.msk.msra.mxu1 %vm115_vm0, %v36_v11  ;;  %389 = vmatpush.xpose.msk.msra.mxu2 %vm115_vm0, %v36_v11 }
  0x25   :  { %390 = vmatpush.xpose.msk.msra.mxu3 %vm115_vm0, %v36_v11 }
  0x27   :  { %257 = vperm.xlu2 %409, %v253_v40  }
  0x28   :  { %354 = vmatpush.xpose.msk.msra.mxu1 %vm115_vm0, %v35_v14  ;;  %391 = vmatpush.xpose.msk.msra.mxu2 %vm115_vm0, %v35_v14 }
  0x29   :  { %392 = vmatpush.xpose.msk.msra.mxu3 %vm115_vm0, %v35_v14  ;;  %306 = vperm.xlu0 %407, %v298_v26  }
  0x2a   :  { %301 = vperm.xlu1 %408, %v297_v28  }
  0x2c   :  { %355 = vmatpush.xpose.msk.msra.mxu1 %vm115_vm0, %v34_v16  ;;  %393 = vmatpush.xpose.msk.msra.mxu2 %vm115_vm0, %v34_v16 }
  0x2d   :  { %394 = vmatpush.xpose.msk.msra.mxu3 %vm115_vm0, %v34_v16 }
  0x2f   :  { %323 = vperm.xlu2 %409, %v320_v42  }
  0x30   :  { %356 = vmatpush.xpose.msk.msra.mxu1 %vm115_vm0, %v33_v18  ;;  %395 = vmatpush.xpose.msk.msra.mxu2 %vm115_vm0, %v33_v18 }
  0x31   :  { %396 = vmatpush.xpose.msk.msra.mxu3 %vm115_vm0, %v33_v18 }
  0x34   :  { %357 = vmatpush.xpose.msk.msra.mxu1 %vm115_vm0, %v32_v20  ;;  %397 = vmatpush.xpose.msk.msra.mxu2 %vm115_vm0, %v32_v20 }
  0x35   :  { %398 = vmatpush.xpose.msk.msra.mxu3 %vm115_vm0, %v32_v20  ;;  %v252_v20 = vld [vmem:[%s671_s3 + $0x8] sm:$0x3]  ;;  %s437_s3 = smov [#allocation3]  }
  0x36   :  { %s334_s9 = sshll.u32 %s437_s3, 4  ;;  %s335_s9 = int_to_ptr.vmem [resolvable:$true] %s334_s9 }
  0x38   :  { %358 = vmatpush.xpose.msk.msra.mxu1 %vm115_vm0, %v31_v22  ;;  %399 = vmatpush.xpose.msk.msra.mxu2 %vm115_vm0, %v31_v22 }
  0x39   :  { %400 = vmatpush.xpose.msk.msra.mxu3 %vm115_vm0, %v31_v22 }
  0x3c   :  { %359 = vmatpush.xpose.msk.msra.mxu1 %vm115_vm0, %v30_v24  ;;  %401 = vmatpush.xpose.msk.msra.mxu2 %vm115_vm0, %v30_v24 }
  0x3d   :  { %402 = vmatpush.xpose.msk.msra.mxu3 %vm115_vm0, %v30_v24 }
  0x40   :  { %360 = vmatpush.xpose.msk.msra.mxu1 %vm115_vm0, %v29_v27  ;;  %403 = vmatpush.xpose.msk.msra.mxu2 %vm115_vm0, %v29_v27 }
  0x41   :  { %404 = vmatpush.xpose.msk.msra.mxu3 %vm115_vm0, %v29_v27 }
  0x43   :  { %361 = vmatmul.msk.f32.vlgmr.msra.gmra.mxu1 %vm115_vm0, %v45_v29  ;;  %365 = vmatmul.msk.f32.vlgmr.msra.gmra.mxu2 %vm115_vm0, %v49_v30 }
  0x44   :  { %368 = vmatmul.msk.f32.vlgmr.msra.gmra.mxu3 %vm115_vm0, %v52_v31 }
  0x4b   :  { %362 = vmatmul.msk.f32.gmra.mxu1 %vm115_vm0, %v46_v33  ;;  %366 = vmatmul.msk.f32.gmra.mxu2 %vm115_vm0, %v50_v34 }
  0x4c   :  { %369 = vmatmul.msk.f32.gmra.mxu3 %vm115_vm0, %v53_v35 }
  0x53   :  { %363 = vmatmul.msk.f32.gmra.mxu1 %vm115_vm0, %v47_v37  ;;  %367 = vmatmul.msk.f32.gmra.mxu2 %vm115_vm0, %v51_v38 }
  0x54   :  { %370 = vmatmul.msk.f32.gmra.mxu3 %vm115_vm0, %v54_v39 }
  0x5b   :  { %364 = vmatmul.msk.f32.gmra.mxu1 %vm115_vm0, %v48_v41 }
  0x69   :  { %v93_v51 = vpop.permute.xlu2 %92 }
  0x71   :  { %v88_v61 = vpop.permute.xlu2 %87 }
  0x79   :  { %v73_v11 = vpop.permute.xlu2 %72 }
  0x7b   :  { %v113_v46 = vpop.permute.xlu0 %112 }
  0x7c   :  { %v103_v48 = vpop.permute.xlu1 %102 }
  0x81   :  { %v258_v23 = vpop.permute.xlu2 %257 }
  0x83   :  { %v108_v52 = vpop.permute.xlu0 %107 }
  0x84   :  { %v98_v57 = vpop.permute.xlu1 %97 }
  0x89   :  { %v324_v39 = vpop.permute.xlu2 %323 }
  0x8a   :  { %v326_v41 = vperm.slane %v324_v39, 0 }
  0x8b   :  { %v83_v0 = vpop.permute.xlu0 %82 }
  0x8c   :  { %v78_v8 = vpop.permute.xlu1 %77 }
  0x93   :  { %v68_v14 = vpop.permute.xlu0 %67 }
  0x94   :  { %v263_v22 = vpop.permute.xlu1 %262 }
  0x9b   :  { %v307_v29 = vpop.permute.xlu0 %306 }
  0x9c   :  { %v302_v30 = vpop.permute.xlu1 %301 }
  0xc0   :  { %v211_v43 = vpop.f32.mrf.mxu1 }
  0xc1   :  { %v212_v15 = vadd.f32 %v211_v43, %v68_v14 }
  0xc3   :  { %v241_v18 = vmax.f32 %v212_v15, 0.0 }
  0xc6   :  { %v223_v44 = vpop.f32.mrf.mxu2 }
  0xc7   :  { %v232_v45 = vpop.f32.mrf.mxu3  ;;  %v224_v4 = vadd.f32 %v223_v44, %v88_v61 }
  0xc8   :  { %v214_v47 = vpop.f32.mrf.mxu1  ;;  %v233_v59 = vadd.f32 %v232_v45, %v103_v48 }
  0xc9   :  { %v245_v9 = vmax.f32 %v224_v4, 0.0  ;;  %v215_v12 = vadd.f32 %v214_v47, %v73_v11 }
  0xca   :  { %v248_v1 = vmax.f32 %v233_v59, 0.0 }
  0xcb   :  { %v242_v17 = vmax.f32 %v215_v12, 0.0 }
  0xce   :  { %v226_v49 = vpop.f32.mrf.mxu2 }
  0xcf   :  { %v235_v50 = vpop.f32.mrf.mxu3  ;;  %v227_v2 = vadd.f32 %v226_v49, %v93_v51 }
  0xd0   :  { %v217_v53 = vpop.f32.mrf.mxu1  ;;  %v236_v55 = vadd.f32 %v235_v50, %v108_v52 }
  0xd1   :  { %v246_v6 = vmax.f32 %v227_v2, 0.0  ;;  %v218_v10 = vadd.f32 %v217_v53, %v78_v8 }
  0xd2   :  { %v249_v62 = vmax.f32 %v236_v55, 0.0 }
  0xd3   :  { %v243_v16 = vmax.f32 %v218_v10, 0.0 }
  0xd6   :  { %v229_v58 = vpop.f32.mrf.mxu2 }
  0xd7   :  { %v238_v54 = vpop.f32.mrf.mxu3  ;;  %v230_v63 = vadd.f32 %v229_v58, %v98_v57 }
  0xd8   :  { %v239_v56 = vadd.f32 %v238_v54, %v113_v46  ;;  %v220_v3 = vpop.f32.mrf.mxu1 }
  0xd9   :  { %v247_v5 = vmax.f32 %v230_v63, 0.0  ;;  %v221_v7 = vadd.f32 %v220_v3, %v83_v0 }
  0xda   :  { %v250_v60 = vmax.f32 %v239_v56, 0.0 }
  0xdb   :  { %v244_v13 = vmax.f32 %v221_v7, 0.0 }
  0xdc   :  { %278 = vmatpush.msra.mxu0 %v250_v60 }
  0xde   :  { %279 = vmatpush.msra.mxu0 %v249_v62 }
  0xe0   :  { %280 = vmatpush.msra.mxu0 %v248_v1 }
  0xe2   :  { %281 = vmatpush.msra.mxu0 %v247_v5 }
  0xe4   :  { %282 = vmatpush.msra.mxu0 %v246_v6 }
  0xe6   :  { %283 = vmatpush.msra.mxu0 %v245_v9 }
  0xe8   :  { %284 = vmatpush.msra.mxu0 %v244_v13 }
  0xea   :  { %285 = vmatpush.msra.mxu0 %v243_v16 }
  0xec   :  { %286 = vmatpush.msra.mxu0 %v242_v17 }
  0xee   :  { %287 = vmatpush.msra.mxu0 %v241_v18 }
  0xef   :  { %371 = vmatmul.msk.f32.vlgmr.msra.gmra.mxu0 %vm265_vm1, %v251_v19 }
  0xf7   :  { %372 = vmatmul.msk.f32.gmra.mxu0 %vm265_vm1, %v252_v20 }
 0x16c   :  { %v289_v21 = vpop.f32.mrf.mxu0 }
 0x16d   :  { %v290_v24 = vadd.f32 %v289_v21, %v258_v23 }
 0x16f   :  { %v295_v27 = vmax.f32 %v290_v24, 0.0 }
 0x171   :  { %v309_v32 = vmul.f32 %v302_v30, %v295_v27 }
 0x174   :  { %v292_v25 = vpop.f32.mrf.mxu0 }
 0x175   :  { %v293_v26 = vadd.f32 %v292_v25, %v263_v22 }
 0x177   :  { %v296_v28 = vmax.f32 %v293_v26, 0.0 }
 0x179   :  { %v310_v31 = vmul.f32 %v307_v29, %v296_v28 }
 0x17b   :  { %v312_v33 = vsel %vm311_vm2, %v310_v31, 0.0 }
 0x17c   :  { %v313_v34 = vadd.f32 %v312_v33, %v309_v32 }
 0x17e   :  { %v314_v35 = vrot.slane %v313_v34, 4 }
 0x180   :  { %v315_v36 = vadd.f32 %v314_v35, %v313_v34 }
 0x182   :  { %v316_v37 = vrot.slane %v315_v36, 2 }
 0x184   :  { %v317_v38 = vadd.f32 %v316_v37, %v315_v36 }
 0x186   :  { %v318_v40 = vrot.slane %v317_v38, 1 }
 0x188   :  { %v319_v42 = vadd.f32 %v318_v40, %v317_v38 }
 0x18a   :  { %v327_v43 = vadd.f32 %v326_v41, %v319_v42 }
 0x18c   :  { %328 = vst [vmem:[#allocation3] sm:$0x1] %v327_v43 }
 0x18d   :  { %339 = dma.vmem_to_hbm [thread:$0]  %s335_s9, 16, %s337_s0, [#allocation4]  }
 0x18e   :  { %434 = dma.done.wait [#allocation4], 16  }
 0x18f   :  { %435 = vsyncadd [#allocation4], 4294967280 }
 0x190   :  { %344 = vsyncpa [#allocation4], 1 }

</bundles_post_ra>
